<compile_context>
chip_gen: v7x
topology: tpu7x:2x2x1
jax: 0.10.0
libtpu: 0.0.40
codegen_flags: <defaults>
</compile_context>

<pallas_src>
import jax
import jax.numpy as jnp
from jax.experimental import pallas as pl
from jax.experimental.pallas import tpu as pltpu


def _downsample_kernel(p_ref, w_ref, b_ref, o_ref):
    # p_ref: (1, 9*Cin, Ms)  im2col patch strip (taps*channels on sublanes,
    #                        flattened output pixels on lanes)
    # w_ref: (Cout, 9*Cin)   conv weights, 3x3 taps folded into K
    # b_ref: (Cout, 1)       bias (f32)
    # o_ref: (1, Cout, Ms)   flattened-NCHW output strip
    acc = jnp.dot(w_ref[...], p_ref[0], preferred_element_type=jnp.float32)
    o_ref[0] = (acc + b_ref[...]).astype(o_ref.dtype)


def _round_up(x, m):
    return ((x + m - 1) // m) * m


def _const_spec(shape):
    # Constant-index operands (weights / bias): fetched once, so request a
    # single VMEM buffer when the installed JAX supports per-operand buffering.
    try:
        return pl.BlockSpec(shape, lambda n, m: (0, 0),
                            pipeline_mode=pl.Buffered(1))
    except (AttributeError, TypeError):
        return pl.BlockSpec(shape, lambda n, m: (0, 0))


def downsample_forward(x_nchw, weight_oihw, bias):
    """Downsample.forward: Conv2d(k=3, stride=2, pad=1, bias=True). NCHW in/out."""
    N, Cin, H, W = x_nchw.shape
    Cout = weight_oihw.shape[0]
    Ho = (H + 2 - 3) // 2 + 1
    Wo = (W + 2 - 3) // 2 + 1
    M = Ho * Wo
    K = 9 * Cin
    dt = x_nchw.dtype
    itm = jnp.dtype(dt).itemsize

    # --- strip-size selection (VMEM budgeting) -------------------------------
    # Ms lanes per grid step: multiple of 128, <= 1024; shrink until the
    # per-step working set (double-buffered patches + output strips,
    # single-buffered weights) fits ~48 MiB -> safe on v7x's 64 MiB/TC VMEM.
    VMEM_BUDGET = 48 * 1024 * 1024

    def vmem_need(ms):
        return (2 * K * ms * itm          # patches strip, double-buffered
                + 2 * Cout * ms * itm     # output strip, double-buffered
                + Cout * K * itm          # weights, single-buffered
                + Cout * 4)               # bias

    Ms = min(_round_up(M, 128), 1024)
    while Ms > 128 and vmem_need(Ms) > VMEM_BUDGET:
        Ms -= 128
    M_pad = _round_up(M, Ms)              # Ms | M_pad by construction
    num_strips = M_pad // Ms

    # --- wrapper glue: stride-2 im2col gather (one fused XLA pass, NCHW-major)
    # TODO(synk): move this gather into the kernel to avoid re-reading a
    # 2.25x-sized intermediate from HBM on a memory-bound op.
    x_pad = jnp.pad(x_nchw, ((0, 0), (0, 0), (1, 1), (1, 1)))
    taps = []
    for kh in range(3):
        for kw in range(3):
            taps.append(
                jax.lax.slice(
                    x_pad,
                    (0, 0, kh, kw),
                    (N, Cin, kh + 2 * Ho - 1, kw + 2 * Wo - 1),
                    (1, 1, 2, 2)))                       # (N, Cin, Ho, Wo)
    patches = jnp.stack(taps, axis=1).reshape(N, K, M)   # (N, 9*Cin, Ho*Wo)
    if M_pad != M:
        patches = jnp.pad(patches, ((0, 0), (0, 0), (0, M_pad - M)))

    # Fold taps into the contraction dim; ordering matches (kh, kw, ci) above.
    # Cast to the activation dtype so bf16 models use the bf16 MXU rate.
    w2d = jnp.transpose(weight_oihw, (0, 2, 3, 1)).reshape(Cout, K).astype(dt)
    b2d = bias.reshape(Cout, 1).astype(jnp.float32)

    vmem_limit = int(min(56 * 1024 * 1024,
                         max(16 * 1024 * 1024, 2 * vmem_need(Ms))))

    out_flat = pl.pallas_call(
        _downsample_kernel,
        out_shape=jax.ShapeDtypeStruct((N, Cout, M_pad), dt),
        grid_spec=pltpu.PrefetchScalarGridSpec(
            num_scalar_prefetch=0,
            grid=(N, num_strips),
            in_specs=[
                pl.BlockSpec((1, K, Ms), lambda n, m: (n, 0, m)),
                _const_spec((Cout, K)),
                _const_spec((Cout, 1)),
            ],
            out_specs=pl.BlockSpec((1, Cout, Ms), lambda n, m: (n, 0, m)),
        ),
        compiler_params=pltpu.CompilerParams(
            dimension_semantics=("parallel", "parallel"),
            vmem_limit_bytes=vmem_limit,
        ),
    )(patches, w2d, b2d)

    return out_flat[:, :, :M].reshape(N, Cout, Ho, Wo)   # already NCHW


if __name__ == "__main__":
    # Downsample(dim=4, dim_out=8); x: (2, 4, 16, 16) -> out: (2, 8, 8, 8)
    dim, dim_out = 4, 8
    N, H, W = 2, 16, 16

    key = jax.random.PRNGKey(0)
    kx, kw, kb = jax.random.split(key, 3)
    x = jax.random.normal(kx, (N, dim, H, W), dtype=jnp.float32)
    weight = jax.random.normal(kw, (dim_out, dim, 3, 3), dtype=jnp.float32) * 0.1
    bias = jax.random.normal(kb, (dim_out,), dtype=jnp.float32) * 0.1

    out = downsample_forward(x, weight, bias)
    out = jax.block_until_ready(out)

    # Reference check (plain JAX conv).
    ref = jax.lax.conv_general_dilated(
        x, weight, window_strides=(2, 2), padding=((1, 1), (1, 1)),
        dimension_numbers=("NCHW", "OIHW", "NCHW")) + bias.reshape(1, -1, 1, 1)

    assert out.shape == (N, dim_out, (H + 1) // 2, (W + 1) // 2)
    assert jnp.allclose(out, ref, atol=1e-4, rtol=1e-4)

    print("KERNEL_OK")
</pallas_src>

<mosaic_0001>
module attributes {stable_mosaic.version = 11 : i64} {
  func.func @_downsample_kernel(%arg0: i32, %arg1: i32, %arg2: memref<1x36x128xf32, #tpu.memory_space<vmem>>, %arg3: memref<8x36xf32, #tpu.memory_space<vmem>>, %arg4: memref<8x1xf32, #tpu.memory_space<vmem>>, %arg5: memref<1x8x128xf32, #tpu.memory_space<vmem>>) attributes {dimension_semantics = [#tpu.dimension_semantics<parallel>, #tpu.dimension_semantics<parallel>], iteration_bounds = array<i64: 2, 1>, scalar_prefetch = 0 : i64, scratch_operands = 0 : i64, tpu.core_type = #tpu.core_type<tc>, window_params = [{transform_indices = @transform_0, window_bounds = array<i64: 1, 36, 128>}, {pipeline_mode = #tpu.pipeline_mode<synchronous>, transform_indices = @transform_1, window_bounds = array<i64: 8, 36>}, {pipeline_mode = #tpu.pipeline_mode<synchronous>, transform_indices = @transform_2, window_bounds = array<i64: 8, 1>}, {transform_indices = @transform_3, window_bounds = array<i64: 1, 8, 128>}]} {
    %c0 = arith.constant 0 : index
    %c0_0 = arith.constant 0 : index
    %0 = vector.load %arg3[%c0, %c0_0] : memref<8x36xf32, #tpu.memory_space<vmem>>, vector<8x36xf32>
    %c0_1 = arith.constant 0 : index
    %c0_2 = arith.constant 0 : index
    %c0_3 = arith.constant 0 : index
    %1 = vector.load %arg2[%c0_1, %c0_2, %c0_3] : memref<1x36x128xf32, #tpu.memory_space<vmem>>, vector<1x36x128xf32>
    %2 = vector.shape_cast %1 : vector<1x36x128xf32> to vector<36x128xf32>
    %cst = arith.constant dense<0.000000e+00> : vector<8x128xf32>
    %3 = tpu.matmul %0, %2, %cst {dimension_numbers = #tpu.dot_dimension_numbers<[1], [0], [0], [1], [0, 0, 1, 1], [], []>} : vector<8x36xf32>, vector<36x128xf32>, vector<8x128xf32> -> vector<8x128xf32>
    %c0_4 = arith.constant 0 : index
    %c0_5 = arith.constant 0 : index
    %4 = vector.load %arg4[%c0_4, %c0_5] : memref<8x1xf32, #tpu.memory_space<vmem>>, vector<8x1xf32>
    %5 = vector.broadcast %4 : vector<8x1xf32> to vector<8x128xf32>
    %6 = arith.addf %3, %5 : vector<8x128xf32>
    %c0_6 = arith.constant 0 : index
    %c0_7 = arith.constant 0 : index
    %c0_8 = arith.constant 0 : index
    %7 = vector.load %arg5[%c0_6, %c0_7, %c0_8] : memref<1x8x128xf32, #tpu.memory_space<vmem>>, vector<1x8x128xf32>
    %8 = vector.shape_cast %7 : vector<1x8x128xf32> to vector<8x128xf32>
    %9 = vector.shape_cast %6 : vector<8x128xf32> to vector<1x8x128xf32>
    tpu.vector_store %arg5[%c0_6, %c0_7, %c0_8], %9 {strides = array<i32>} : memref<1x8x128xf32, #tpu.memory_space<vmem>>, vector<1x8x128xf32>,
    return
  }
  func.func @transform_0(%arg0: i32, %arg1: i32) -> (i32, i32, i32) {
    %c0_i32 = arith.constant 0 : i32
    %c0_i32_0 = arith.constant 0 : i32
    return %arg0, %c0_i32, %arg1 : i32, i32, i32
  }
  func.func @transform_1(%arg0: i32, %arg1: i32) -> (i32, i32) {
    %c0_i32 = arith.constant 0 : i32
    %c0_i32_0 = arith.constant 0 : i32
    %c0_i32_1 = arith.constant 0 : i32
    return %c0_i32, %c0_i32_0 : i32, i32
  }
  func.func @transform_2(%arg0: i32, %arg1: i32) -> (i32, i32) {
    %c0_i32 = arith.constant 0 : i32
    %c0_i32_0 = arith.constant 0 : i32
    %c0_i32_1 = arith.constant 0 : i32
    return %c0_i32, %c0_i32_0 : i32, i32
  }
  func.func @transform_3(%arg0: i32, %arg1: i32) -> (i32, i32, i32) {
    %c0_i32 = arith.constant 0 : i32
    %c0_i32_0 = arith.constant 0 : i32
    return %arg0, %c0_i32, %arg1 : i32, i32, i32
  }
}

</mosaic_0001>

<bundles_post_ra>
// kernel: tpu_custom_call.1
= control target key start
LH: loop header
LB: loop body
LE: loop exit
PB: predicated region body
PF: predicated region fallthrough
CT: control target
= control target key end

     0   :  { %8 = vsyncpa [#allocation3], 0  ;;  %s696_s0 = inlined_call_operand.vmem [shape: f32[2,36,128], index: 0, kind: input, shape index: {}]   ;;  %s697_s1 = inlined_call_operand.vmem [shape: f32[8,36], index: 1, kind: input, shape index: {}]   ;;  %s698_s2 = inlined_call_operand.vmem [shape: f32[8,1], index: 2, kind: input, shape index: {}]   ;;  %s699_s3 = inlined_call_operand.hbm [shape: f32[2,8,128], index: 3, kind: output, shape index: {}]  }
   0x1   :  { %10 = vsyncpa [#allocation3 + $0x1], 0  ;;  %s578_s12 = smov 0   ;;  %s580_s13 = smov 0  }
   0x2   :  { %s582_s14 = smov 0   ;;  %s584_s15 = smov 0  }
   0x3   :  { %s586_s16 = smov 0   ;;  %s588_s17 = smov 0  }
   0x4 LB: > { %s374_s18 = sadd.s32 4294967295, %s551_s17   ;;  %s375_s19 = sadd.s32 4294967294, %s551_s17   ;;  %s551_s17 = sphi %s588_s17, %s16_s17   ;;  %s547_s16 = sphi %s586_s16, %s706_s16   ;;  %s543_s15 = sphi %s584_s15, %s705_s15   ;;  %s539_s14 = sphi %s582_s14, %s704_s14   ;;  %s535_s13 = sphi %s580_s13, %s703_s13   ;;  %s531_s12 = sphi %s578_s12, %s702_s12  }
   0x5   : > { %s28_s20 = sadd.s32 1, %s547_s16  ;;  %s107_s21 = sadd.s32 1, %s539_s14 }
   0x6   : > { %p30_p0 = scmp.ge.s32.totalorder %s28_s20, 2  ;;  %p117_p1 = scmp.ne.s32.totalorder %s539_s14, %s535_s13 }
   0x7   : > { %p118_p2 = scmp.eq.s32.totalorder %s374_s18, 1  ;;  %p123_p3 = scmp.ne.s32.totalorder %s535_s13, %s531_s12 }
   0x8   : > { %s708_s20 = smov (%p30_p0, %s28_s20), 0  ;;  %p124_p5 = scmp.eq.s32.totalorder %s375_s19, 1 }
   0x9   : > { %p618_p4 = por %p118_p2, %p117_p1  ;;  %s102_s23 = ssub.s32 %s547_s16, %s708_s20 }
   0xa   : > { %p378_p6 = scmp.ge.s32.totalorder %s551_s17, 1  ;;  %p105_p7 = scmp.eq.s32.totalorder %s102_s23, 0 }
   0xb   : > { %p625_p8 = por %p124_p5, %p123_p3  ;;  %p159_p9 = scmp.lt.s32.totalorder %s551_s17, 3 }
   0xc   : > { %s631_s25 = scalar_select %p105_p7, %s539_s14, %s107_s21  }
   0xd   : > { %p160_p10 = pnand %p378_p6, %p159_p9 }
   0xe   : > { %p186_p11 = scmp.lt.s32.totalorder (!%p160_p10), %s543_s15, 1  ;;  %v553_v0 = vmov (!%p160_p10), 0.0|0.0   ;;  %vm554_vm0 = vmmov (!%p160_p10), 0   ;;  %v555_v1 = vmov (!%p160_p10), 0.0   ;;  %v200_v2 = vld [vmem:[%s698_s2] sm:$0xff] (!%p160_p10)  ;;  %v556_v3 = vmov (!%p160_p10), 0  }
   0xf   : > { %163 = sbr.rel (%p160_p10) target bundleno = 267 (0x10b), region = 32  ;;  %406 = vmatprep.subr.bf16.mxu0 (!%p160_p10), %v553_v0  ;;  %403 = vmatprep.mubr.msk.f32.mxu0 (!%p160_p10), %vm554_vm0, %v555_v1  ;;  %vm210_vm1 = vcmask (!%p160_p10), 1043456   ;;  %v194_v11 = vld [vmem:[%s697_s1] sm:$0xff] (!%p160_p10)  ;;  %vm206_vm2 = vcmask (!%p160_p10), 293888   ;;  %s183_s8 = sand.u32 (!%p160_p10), 1, %s535_s13  }
  0x10   : > { %472 = vset.pattern.permute.xlu0 (!%p160_p10), %v556_v3  ;;  %s379_s9 = sshll.u32 (!%p160_p10), %s183_s8, 3  ;;  %s384_s10 = sshll.u32 (!%p160_p10), %s543_s15, 7 }
  0x11   : > { %203 = vperm.xlu0 (!%p160_p10), %472, %v200_v2   ;;  %s185_s11 = scalar_lea.vmem (!%p160_p10), [#allocation2], %s379_s9  ;;  %s649_s23 = scalar_lea.hbm (!%p160_p10), %s699_s3, %s384_s10 }
  0x12   : > { %s300_s18 = sshll.u32 (!%p160_p10), %s185_s11, 4  ;;  %s286_s26 = scalar_lea.sflag (!%p160_p10), [#allocation3], %s183_s8  ;;  %s651_s18 = int_to_ptr.vmem [resolvable:$true] %s300_s18 }
  0x13   : > { %s473_s27 = scalar_lea.vmem (!%p160_p10), %s651_s18, 128 }
  0x14   : > { %p474_p12 = scmp.ne.s32.totalorder (!%p160_p10), %s651_s18, %s473_s27 }
  0x16   : > { %s187_s28 = scalar_select %p186_p11, %s543_s15, 1 }
  0x17   : > { %p475_p13 = pnand %p474_p12, %p618_p4  ;;  %s557_s15 = smov [#allocation2]  }
  0x18   : > { %s412_s29 = smul.u32 40, %s187_s28  ;;  %s477_s28 = sshll.u32 %s557_s15, 4  ;;  %s478_s28 = int_to_ptr.vmem [resolvable:$false] %s477_s28 }
  0x19   : > { %p476_p0 = pneg %p475_p13  ;;  %p480_p1 = scmp.lt.s32.totalorder %s651_s18, %s478_s28 }
  0x1a   : > { %s193_s5 = scalar_lea.vmem %s696_s0, %s412_s29  ;;  %s479_s29 = scalar_lea.vmem %s478_s28, 256 }
  0x1b   : > { %v195_v4 = vld [vmem:[%s193_s5] sm:$0xff]  ;;  %v196_v5 = vld [vmem:[%s193_s5 + $0x8] sm:$0xff]  ;;  %v197_v6 = vld [vmem:[%s193_s5 + $0x10] sm:$0xff]  ;;  %p481_p2 = scmp.lt.s32.totalorder %s479_s29, %s473_s27 }
  0x1c   : > { %v407_v7 = vpack.c.bf16 %v196_v5, %v195_v4  ;;  %v198_v8 = vld [vmem:[%s193_s5 + $0x18] sm:$0xff]  ;;  %v199_v10 = vld [vmem:[%s193_s5 + $0x20] sm:$0xf] }
  0x1d   : > { %v410_v9 = vpack.c.bf16 %v198_v8, %v197_v6  ;;  %p482_p3 = por %p481_p2, %p480_p1 }
  0x1e   : > { %408 = vmatpush3.bf16.msra.mxu0 %v407_v7 }
  0x1f   : > { %409 = vmatprep.subr.bf16.mxu0 %v553_v0  ;;  %p483_p5 = pnand %p482_p3, %p476_p0 }
  0x22   : > { %411 = vmatpush3.bf16.msra.mxu0 %v410_v9 }
  0x23   : > { %401 = vmatprep.subr.mxu0 %v555_v1 }
  0x26   : > { %402 = vmatpush3.msk.msra.mxu0 %vm210_vm1, %v199_v10 }
  0x27   : > { %404 = vmatmul.mubr.msk.f32.vlgmr.msra.gmra.mrb[0].mxu0 %vm206_vm2, %v194_v11 }
  0x90   : > { %v204_v12 = vpop.permute.xlu0 %203 }
  0xfa   : > { %v280_v13 = vpop.f32.mrb[0].mxu0 }
  0xfb   : > { %v281_v14 = vadd.f32 %v280_v13, %v204_v12  ;;  %v405_v15 = vpop.f32.mrb[1].mxu0 }
  0xfd   : > { %284 = vst [vmem:[%s185_s11] sm:$0xff] %v281_v14 }
  0xfe   : > { %486 = shalt.err (!%p483_p5)
}
  0xff   : > { %s487_s30 = scalar_lea.hbm %s649_s23, 128  ;;  %s491_s6 = scalar_lea.hbm %s699_s3, 256 }
 0x100   : > { %p488_p6 = scmp.ne.s32.totalorder %s649_s23, %s487_s30  ;;  %p492_p10 = scmp.lt.u32.totalorder %s649_s23, %s699_s3 }
 0x101   : > { %p493_p11 = scmp.lt.u32.totalorder %s491_s6, %s487_s30  ;;  %p495_p13 = scmp.lt.u32.totalorder %s487_s30, %s649_s23 }
 0x102   : > { %p489_p7 = pnand %p488_p6, %p618_p4 }
 0x103   : > { %p494_p12 = por %p493_p11, %p492_p10 }
 0x104   : > { %p490_p9 = pneg %p489_p7 }
 0x105   : > { %p496_p0 = por %p495_p13, %p494_p12 }
 0x107   : > { %p497_p1 = pnand %p496_p0, %p490_p9 }
 0x109   : > { %500 = shalt.err (!%p497_p1)
}
 0x10a   : > { %413 = dma.vmem_to_hbm [thread:$0]  (%p618_p4), %s651_s18, 128, %s649_s23, %s286_s26  }
 0x10b PF: > { %p419_p2 = scmp.ge.s32.totalorder %s551_s17, 2  ;;  %s312_s9 = sand.u32 1, %s531_s12  }
 0x10c   : > { %s313_s10 = scalar_lea.sflag [#allocation3], %s312_s9 }
 0x10d   : > { %p416_p3 = pnand %p419_p2, %p625_p8 }
 0x10f   : > { %526 = dma.done.wait (!%p416_p3), %s313_s10, 128  }
 0x110   : > { %528 = vsyncadd (!%p416_p3), %s313_s10, 4294967168  ;;  %s16_s17 = sadd.s32 1, %s551_s17   ;;  %s702_s12 = smov %s535_s13 }
 0x111   : > { %p13_p5 = scmp.ge.s32.totalorder %s16_s17, 4   ;;  %s703_s13 = smov %s539_s14 }
 0x112   : > { %s704_s14 = smov %s631_s25  ;;  %s705_s15 = smov %s547_s16 }
 0x113   : > { %s706_s16 = smov %s708_s20  ;;  %15 = sbr.rel (!%p13_p5) target bundleno = 4 (0x4), region = 67 }
 0x11a   :  { %318 = vsyncpa [#allocation3], 1 }
 0x11b   :  { %320 = vsyncpa [#allocation3 + $0x1], 1 }

</bundles_post_ra>
